<compile_context>
chip_gen: v5e
topology: v5e:2x2
jax: 0.10.0
libtpu: 0.0.40
codegen_flags: <defaults>
</compile_context>

<pallas_src>
import jax
import jax.numpy as jnp
from jax.experimental import pallas as pl
from jax.experimental.pallas import tpu as pltpu


def _round_up(x: int, m: int) -> int:
    return ((x + m - 1) // m) * m


def _acil_kernel(x_ref, wbuf_ref, wcls_ref, o_ref, acc_ref):
    """One (row_tile, buf_tile) step of relu(X @ Wb) @ Wa with a resident acc."""
    k = pl.program_id(1)

    @pl.when(k == 0)
    def _():
        acc_ref[...] = jnp.zeros_like(acc_ref)

    # Random-projection matmul -> ReLU -> classifier matmul, fused per BUF tile.
    h = jnp.dot(x_ref[...], wbuf_ref[...], preferred_element_type=jnp.float32)
    h = jnp.maximum(h, 0.0)  # RandomBuffer ReLU (elementwise per BUF column)
    acc_ref[...] += jnp.dot(h, wcls_ref[...], preferred_element_type=jnp.float32)

    @pl.when(k == pl.num_programs(1) - 1)
    def _():
        o_ref[...] = acc_ref[...].astype(o_ref.dtype)


def acil_forward(x, w_buffer, w_analytic, *, row_tile=256, buf_tile=1024):
    """x: [N, D], w_buffer: [D, BUF], w_analytic: [BUF, C] -> [N, C] (float32)."""
    N, D = x.shape
    D2, BUF = w_buffer.shape
    BUF2, C = w_analytic.shape
    assert D == D2 and BUF == BUF2

    # Row tile: multiple of 8 sublanes; shrink to the (padded) problem if tiny.
    row_tile_eff = min(row_tile, _round_up(N, 8))
    n_pad = _round_up(N, row_tile_eff)

    # BUF tile: multiple of 128 lanes; shrink to the (padded) problem if tiny.
    buf_tile_eff = min(buf_tile, _round_up(BUF, 128))
    buf_pad = _round_up(BUF, buf_tile_eff)

    # Lane-dense output: pad classes to a multiple of 128.
    c_pad = _round_up(C, 128)

    x = x.astype(jnp.float32)
    w_buffer = w_buffer.astype(jnp.float32)
    w_analytic = w_analytic.astype(jnp.float32)

    if n_pad != N:
        x = jnp.pad(x, ((0, n_pad - N), (0, 0)))
    if buf_pad != BUF:
        # Zero-padded BUF columns give relu(x @ 0) = 0 and contribute nothing.
        w_buffer = jnp.pad(w_buffer, ((0, 0), (0, buf_pad - BUF)))
        w_analytic = jnp.pad(w_analytic, ((0, buf_pad - BUF), (0, 0)))
    if c_pad != C:
        w_analytic = jnp.pad(w_analytic, ((0, 0), (0, c_pad - C)))

    grid = (n_pad // row_tile_eff, buf_pad // buf_tile_eff)

    flops = 2 * n_pad * D * buf_pad + 2 * n_pad * buf_pad * c_pad
    bytes_accessed = 4 * (
        n_pad * D + D * buf_pad + buf_pad * c_pad + n_pad * c_pad
    )

    out = pl.pallas_call(
        _acil_kernel,
        out_shape=jax.ShapeDtypeStruct((n_pad, c_pad), jnp.float32),
        grid=grid,
        in_specs=[
            # X row tile, resident across the BUF reduction axis.
            pl.BlockSpec((row_tile_eff, D), lambda i, k: (i, 0)),
            # Random-projection weight: one BUF-tile of columns per step.
            pl.BlockSpec((D, buf_tile_eff), lambda i, k: (0, k)),
            # Analytic head weight: matching BUF-tile of rows per step.
            pl.BlockSpec((buf_tile_eff, c_pad), lambda i, k: (k, 0)),
        ],
        # Output tile constant across the BUF axis -> accumulator pattern.
        out_specs=pl.BlockSpec((row_tile_eff, c_pad), lambda i, k: (i, 0)),
        scratch_shapes=[pltpu.VMEM((row_tile_eff, c_pad), jnp.float32)],
        compiler_params=pltpu.CompilerParams(
            dimension_semantics=("parallel", "arbitrary"),
        ),
        cost_estimate=pl.CostEstimate(
            flops=flops, transcendentals=0, bytes_accessed=bytes_accessed
        ),
    )(x, w_buffer, w_analytic)

    return out[:N, :C]


def reference_forward(x, w_buffer, w_analytic):
    h = jnp.maximum(x.astype(jnp.float32) @ w_buffer.astype(jnp.float32), 0.0)
    return h @ w_analytic.astype(jnp.float32)


if __name__ == "__main__":
    # Small, deterministic shapes consistent with the module:
    #   B=2 images, Q=8 queries  -> N = B*Q = 16 rows
    #   input_dim D = 32, buffer_size = 256, num_classes = 16
    B, Q, D = 2, 8, 32
    BUF, NUM_CLASSES = 256, 16
    N = B * Q

    key = jax.random.PRNGKey(0)
    kx, kbuf, kcls = jax.random.split(key, 3)

    # Decoder output features [B*Q, D].
    x = jax.random.normal(kx, (N, D), dtype=jnp.float32)

    # RandomBuffer: frozen random projection weights (nn.Linear-style init).
    w_buffer = jax.random.uniform(
        kbuf, (D, BUF), dtype=jnp.float32,
        minval=-1.0 / jnp.sqrt(D), maxval=1.0 / jnp.sqrt(D))

    # RecursiveLinear weights (post-fit analytic weights; deterministic synthetic values).
    w_analytic = jax.random.normal(kcls, (BUF, NUM_CLASSES), dtype=jnp.float32) * 0.01

    out = acil_forward(x, w_buffer, w_analytic)
    out = jax.block_until_ready(out)

    ref = reference_forward(x, w_buffer, w_analytic)
    assert out.shape == (N, NUM_CLASSES)
    assert jnp.allclose(out, ref, atol=1e-4, rtol=1e-4)

    print("KERNEL_OK")
</pallas_src>

<mosaic_0001>
module attributes {stable_mosaic.version = 11 : i64} {
  func.func @_acil_kernel(%arg0: i32, %arg1: i32, %arg2: memref<16x32xf32, #tpu.memory_space<vmem>>, %arg3: memref<32x256xf32, #tpu.memory_space<vmem>>, %arg4: memref<256x128xf32, #tpu.memory_space<vmem>>, %arg5: memref<16x128xf32, #tpu.memory_space<vmem>>, %arg6: memref<16x128xf32, #tpu.memory_space<vmem>>) attributes {dimension_semantics = [#tpu.dimension_semantics<parallel>, #tpu.dimension_semantics<arbitrary>], iteration_bounds = array<i64: 1, 1>, scalar_prefetch = 0 : i64, scratch_operands = 1 : i64, tpu.core_type = #tpu.core_type<tc>, window_params = [{transform_indices = @transform_0, window_bounds = array<i64: 16, 32>}, {transform_indices = @transform_1, window_bounds = array<i64: 32, 256>}, {transform_indices = @transform_2, window_bounds = array<i64: 256, 128>}, {transform_indices = @transform_3, window_bounds = array<i64: 16, 128>}]} {
    %c0_i32 = arith.constant 0 : i32
    %0 = arith.cmpi eq, %arg1, %c0_i32 : i32
    %1 = arith.extui %0 : i1 to i32
    %c0_i32_0 = arith.constant 0 : i32
    %2 = arith.cmpi ne, %1, %c0_i32_0 : i32
    scf.if %2 {
      %cst_14 = arith.constant 0.000000e+00 : f32
      %16 = vector.broadcast %cst_14 : f32 to vector<16x128xf32>
      %c0_15 = arith.constant 0 : index
      %c0_16 = arith.constant 0 : index
      %17 = vector.load %arg6[%c0_15, %c0_16] : memref<16x128xf32, #tpu.memory_space<vmem>>, vector<16x128xf32>
      tpu.vector_store %arg6[%c0_15, %c0_16], %16 {strides = array<i32>} : memref<16x128xf32, #tpu.memory_space<vmem>>, vector<16x128xf32>,
    } else {
    }
    %c0 = arith.constant 0 : index
    %c0_1 = arith.constant 0 : index
    %3 = vector.load %arg2[%c0, %c0_1] : memref<16x32xf32, #tpu.memory_space<vmem>>, vector<16x32xf32>
    %c0_2 = arith.constant 0 : index
    %c0_3 = arith.constant 0 : index
    %4 = vector.load %arg3[%c0_2, %c0_3] : memref<32x256xf32, #tpu.memory_space<vmem>>, vector<32x256xf32>
    %cst = arith.constant dense<0.000000e+00> : vector<16x256xf32>
    %5 = tpu.matmul %3, %4, %cst {dimension_numbers = #tpu.dot_dimension_numbers<[1], [0], [0], [1], [0, 0, 1, 1], [], []>} : vector<16x32xf32>, vector<32x256xf32>, vector<16x256xf32> -> vector<16x256xf32>
    %cst_4 = arith.constant 0.000000e+00 : f32
    %6 = vector.broadcast %cst_4 : f32 to vector<16x256xf32>
    %7 = arith.maximumf %5, %6 : vector<16x256xf32>
    %c0_5 = arith.constant 0 : index
    %c0_6 = arith.constant 0 : index
    %8 = vector.load %arg6[%c0_5, %c0_6] : memref<16x128xf32, #tpu.memory_space<vmem>>, vector<16x128xf32>
    %c0_7 = arith.constant 0 : index
    %c0_8 = arith.constant 0 : index
    %9 = vector.load %arg4[%c0_7, %c0_8] : memref<256x128xf32, #tpu.memory_space<vmem>>, vector<256x128xf32>
    %cst_9 = arith.constant dense<0.000000e+00> : vector<16x128xf32>
    %10 = tpu.matmul %7, %9, %cst_9 {dimension_numbers = #tpu.dot_dimension_numbers<[1], [0], [0], [1], [0, 0, 1, 1], [], []>} : vector<16x256xf32>, vector<256x128xf32>, vector<16x128xf32> -> vector<16x128xf32>
    %11 = arith.addf %8, %10 : vector<16x128xf32>
    %c0_10 = arith.constant 0 : index
    %c0_11 = arith.constant 0 : index
    %12 = vector.load %arg6[%c0_10, %c0_11] : memref<16x128xf32, #tpu.memory_space<vmem>>, vector<16x128xf32>
    tpu.vector_store %arg6[%c0_10, %c0_11], %11 {strides = array<i32>} : memref<16x128xf32, #tpu.memory_space<vmem>>, vector<16x128xf32>,
    %c0_i32_12 = arith.constant 0 : i32
    %13 = arith.cmpi eq, %arg1, %c0_i32_12 : i32
    %14 = arith.extui %13 : i1 to i32
    %c0_i32_13 = arith.constant 0 : i32
    %15 = arith.cmpi ne, %14, %c0_i32_13 : i32
    scf.if %15 {
      %c0_14 = arith.constant 0 : index
      %c0_15 = arith.constant 0 : index
      %16 = vector.load %arg6[%c0_14, %c0_15] : memref<16x128xf32, #tpu.memory_space<vmem>>, vector<16x128xf32>
      %c0_16 = arith.constant 0 : index
      %c0_17 = arith.constant 0 : index
      %17 = vector.load %arg5[%c0_16, %c0_17] : memref<16x128xf32, #tpu.memory_space<vmem>>, vector<16x128xf32>
      tpu.vector_store %arg5[%c0_16, %c0_17], %16 {strides = array<i32>} : memref<16x128xf32, #tpu.memory_space<vmem>>, vector<16x128xf32>,
    } else {
    }
    return
  }
  func.func @transform_0(%arg0: i32, %arg1: i32) -> (i32, i32) {
    %c0_i32 = arith.constant 0 : i32
    %c0_i32_0 = arith.constant 0 : i32
    return %arg0, %c0_i32 : i32, i32
  }
  func.func @transform_1(%arg0: i32, %arg1: i32) -> (i32, i32) {
    %c0_i32 = arith.constant 0 : i32
    %c0_i32_0 = arith.constant 0 : i32
    return %c0_i32, %arg1 : i32, i32
  }
  func.func @transform_2(%arg0: i32, %arg1: i32) -> (i32, i32) {
    %c0_i32 = arith.constant 0 : i32
    %c0_i32_0 = arith.constant 0 : i32
    return %arg1, %c0_i32 : i32, i32
  }
  func.func @transform_3(%arg0: i32, %arg1: i32) -> (i32, i32) {
    %c0_i32 = arith.constant 0 : i32
    %c0_i32_0 = arith.constant 0 : i32
    return %arg0, %c0_i32 : i32, i32
  }
}

</mosaic_0001>

<bundles_post_ra>
// kernel: tpu_custom_call.1
= control target key start
LH: loop header
LB: loop body
LE: loop exit
PB: predicated region body
PF: predicated region fallthrough
CT: control target
= control target key end

     0   :  { %8 = vsyncpa [#allocation4], 0  ;;  %s413_s0 = inlined_call_operand.hbm [shape: f32[16,32], index: 0, kind: input, shape index: {}]   ;;  %s414_s1 = inlined_call_operand.hbm [shape: f32[32,256], index: 1, kind: input, shape index: {}]   ;;  %s415_s2 = inlined_call_operand.hbm [shape: f32[256,128], index: 2, kind: input, shape index: {}]   ;;  %s416_s3 = inlined_call_operand.hbm [shape: f32[16,128], index: 3, kind: output, shape index: {}]  }
   0x1   :  { %9 = vsyncpa [#allocation7], 0  ;;  %s28_s14 = sshll.u32 %s414_s1, 4  ;;  %s29_s14 = int_to_ptr.hbm [resolvable:$true] %s28_s14 }
   0x2   :  { %10 = vsyncpa [#allocation5], 0  ;;  %s360_s15 = smov [#allocation6]   ;;  %s15_s19 = sshll.u32 %s413_s0, 4  ;;  %s16_s19 = int_to_ptr.hbm [resolvable:$true] %s15_s19 }
   0x3   :  { %s30_s16 = sshll.u32 %s360_s15, 4  ;;  %s361_s20 = smov 256   ;;  %s31_s16 = int_to_ptr.vmem [resolvable:$true] %s30_s16 }
   0x4   :  { %s362_s21 = smov 16   ;;  %s363_s22 = smov [#allocation3]  }
   0x5   :  { %36 = dma.hbm_to_vmem [thread:$0]  %s29_s14, 1024, %s31_s16, [#allocation7], %s361_s20, %s361_s20, %s362_s21  }
   0x6   :  { %s17_s23 = sshll.u32 %s363_s22, 4  ;;  %s364_s24 = smov 128   ;;  %s18_s23 = int_to_ptr.vmem [resolvable:$true] %s17_s23 }
   0x7   :  { %s365_s25 = smov 8   ;;  %s41_s27 = sshll.u32 %s415_s2, 4  ;;  %s42_s27 = int_to_ptr.hbm [resolvable:$true] %s41_s27 }
   0x8   :  { %23 = dma.hbm_to_vmem [thread:$0]  %s16_s19, 256, %s18_s23, [#allocation4], %s364_s24, %s364_s24, %s365_s25  }
   0x9   :  { %s366_s28 = smov [#allocation8]  }
   0xa   :  { %s43_s0 = sshll.u32 %s366_s28, 4  ;;  %s44_s0 = int_to_ptr.vmem [resolvable:$true] %s43_s0 }
   0xb   :  { %49 = dma.hbm_to_vmem [thread:$0]  %s42_s27, 4096, %s44_s0, [#allocation7], %s364_s24, %s364_s24, %s365_s25  }
   0xc   :  { %354 = dma.done.wait [#allocation4], 256  }
   0xd   :  { %355 = vsyncadd [#allocation4], 4294967040 }
   0xe   :  { %356 = dma.done.wait [#allocation7], 5120  }
   0xf   :  { %357 = vsyncadd [#allocation7], 4294962176  ;;  %v76_v0 = vld [vmem:[#allocation6 + $0x30] sm:$0xff]  ;;  %v77_v1 = vld [vmem:[#allocation6 + $0x38] sm:$0xff]  ;;  %vm78_vm0 = vcmask 261120   ;;  %s367_s2 = smov [#allocation9]  }
  0x10   :  { %v74_v2 = vld [vmem:[#allocation6 + $0x20] sm:$0xff]  ;;  %97 = vmatpush.msra.mxu0 %v76_v0  ;;  %120 = vmatpush.msra.mxu1 %v77_v1  ;;  %v75_v3 = vld [vmem:[#allocation6 + $0x28] sm:$0xff]  ;;  %v72_v4 = vld [vmem:[#allocation6 + $0x10] sm:$0xff]  ;;  %s230_s29 = sshll.u32 %s367_s2, 4  ;;  %s232_s5 = sshll.u32 %s416_s3, 4  ;;  %s231_s29 = int_to_ptr.vmem [resolvable:$true] %s230_s29  ;;  %s233_s5 = int_to_ptr.hbm [resolvable:$true] %s232_s5 }
  0x11   :  { %v73_v5 = vld [vmem:[#allocation6 + $0x18] sm:$0xff]  ;;  %v70_v6 = vld [vmem:[#allocation6] sm:$0xff]  ;;  %v71_v9 = vld [vmem:[#allocation6 + $0x8] sm:$0xff] }
  0x12   :  { %98 = vmatpush.msra.mxu0 %v74_v2  ;;  %121 = vmatpush.msra.mxu1 %v75_v3  ;;  %v152_v7 = vld [vmem:[#allocation8 + $0x78] sm:$0xff]  ;;  %v151_v10 = vld [vmem:[#allocation8 + $0x70] sm:$0xff]  ;;  %v150_v13 = vld [vmem:[#allocation8 + $0x68] sm:$0xff] }
  0x13   :  { %v168_v8 = vld [vmem:[#allocation8 + $0xf8] sm:$0xff]  ;;  %169 = vmatpush.msra.mxu2 %v152_v7  ;;  %v167_v11 = vld [vmem:[#allocation8 + $0xf0] sm:$0xff]  ;;  %v166_v14 = vld [vmem:[#allocation8 + $0xe8] sm:$0xff] }
  0x14   :  { %192 = vmatpush.msra.mxu3 %v168_v8  ;;  %99 = vmatpush.msra.mxu0 %v72_v4  ;;  %v68_v12 = vld [vmem:[#allocation3] sm:$0xff]  ;;  %v149_v15 = vld [vmem:[#allocation8 + $0x60] sm:$0xff]  ;;  %v148_v17 = vld [vmem:[#allocation8 + $0x58] sm:$0xff] }
  0x15   :  { %122 = vmatpush.msra.mxu1 %v73_v5  ;;  %170 = vmatpush.msra.mxu2 %v151_v10  ;;  %v165_v16 = vld [vmem:[#allocation8 + $0xe0] sm:$0xff]  ;;  %v164_v18 = vld [vmem:[#allocation8 + $0xd8] sm:$0xff]  ;;  %v147_v19 = vld [vmem:[#allocation8 + $0x50] sm:$0xff] }
  0x16   :  { %193 = vmatpush.msra.mxu3 %v167_v11  ;;  %100 = vmatpush.msra.mxu0 %v70_v6  ;;  %v163_v20 = vld [vmem:[#allocation8 + $0xd0] sm:$0xff]  ;;  %v69_v21 = vld [vmem:[#allocation3 + $0x8] sm:$0xff]  ;;  %v146_v22 = vld [vmem:[#allocation8 + $0x48] sm:$0xff] }
  0x17   :  { %123 = vmatpush.msra.mxu1 %v71_v9  ;;  %246 = vmatmul.msk.f32.vlgmr.msra.gmra.mxu0 %vm78_vm0, %v68_v12  ;;  %v162_v23 = vld [vmem:[#allocation8 + $0xc8] sm:$0xff]  ;;  %v145_v24 = vld [vmem:[#allocation8 + $0x40] sm:$0xff]  ;;  %v144_v26 = vld [vmem:[#allocation8 + $0x38] sm:$0xff] }
  0x18   :  { %248 = vmatmul.msk.f32.vlgmr.msra.gmra.mxu1 %vm78_vm0, %v68_v12  ;;  %171 = vmatpush.msra.mxu2 %v150_v13  ;;  %v161_v25 = vld [vmem:[#allocation8 + $0xc0] sm:$0xff]  ;;  %v160_v27 = vld [vmem:[#allocation8 + $0xb8] sm:$0xff]  ;;  %v143_v28 = vld [vmem:[#allocation8 + $0x30] sm:$0xff] }
  0x19   :  { %194 = vmatpush.msra.mxu3 %v166_v14  ;;  %v159_v29 = vld [vmem:[#allocation8 + $0xb0] sm:$0xff]  ;;  %v142_v30 = vld [vmem:[#allocation8 + $0x28] sm:$0xff]  ;;  %v141_v32 = vld [vmem:[#allocation8 + $0x20] sm:$0xff] }
  0x1a   :  { %172 = vmatpush.msra.mxu2 %v149_v15  ;;  %v158_v31 = vld [vmem:[#allocation8 + $0xa8] sm:$0xff]  ;;  %v157_v33 = vld [vmem:[#allocation8 + $0xa0] sm:$0xff]  ;;  %v140_v34 = vld [vmem:[#allocation8 + $0x18] sm:$0xff] }
  0x1b   :  { %195 = vmatpush.msra.mxu3 %v165_v16  ;;  %v156_v35 = vld [vmem:[#allocation8 + $0x98] sm:$0xff]  ;;  %v139_v36 = vld [vmem:[#allocation8 + $0x10] sm:$0xff]  ;;  %v138_v38 = vld [vmem:[#allocation8 + $0x8] sm:$0xff] }
  0x1c   :  { %173 = vmatpush.msra.mxu2 %v148_v17  ;;  %v155_v37 = vld [vmem:[#allocation8 + $0x90] sm:$0xff]  ;;  %v154_v39 = vld [vmem:[#allocation8 + $0x88] sm:$0xff]  ;;  %v137_v40 = vld [vmem:[#allocation8] sm:$0xff] }
  0x1d   :  { %196 = vmatpush.msra.mxu3 %v164_v18  ;;  %v153_v41 = vld [vmem:[#allocation8 + $0x80] sm:$0xff] }
  0x1e   :  { %174 = vmatpush.msra.mxu2 %v147_v19 }
  0x1f   :  { %197 = vmatpush.msra.mxu3 %v163_v20  ;;  %247 = vmatmul.msk.f32.gmra.mxu0 %vm78_vm0, %v69_v21 }
  0x20   :  { %249 = vmatmul.msk.f32.gmra.mxu1 %vm78_vm0, %v69_v21  ;;  %175 = vmatpush.msra.mxu2 %v146_v22 }
  0x21   :  { %198 = vmatpush.msra.mxu3 %v162_v23 }
  0x22   :  { %176 = vmatpush.msra.mxu2 %v145_v24 }
  0x23   :  { %199 = vmatpush.msra.mxu3 %v161_v25 }
  0x24   :  { %177 = vmatpush.msra.mxu2 %v144_v26 }
  0x25   :  { %200 = vmatpush.msra.mxu3 %v160_v27 }
  0x26   :  { %178 = vmatpush.msra.mxu2 %v143_v28 }
  0x27   :  { %201 = vmatpush.msra.mxu3 %v159_v29 }
  0x28   :  { %179 = vmatpush.msra.mxu2 %v142_v30 }
  0x29   :  { %202 = vmatpush.msra.mxu3 %v158_v31 }
  0x2a   :  { %180 = vmatpush.msra.mxu2 %v141_v32 }
  0x2b   :  { %203 = vmatpush.msra.mxu3 %v157_v33 }
  0x2c   :  { %181 = vmatpush.msra.mxu2 %v140_v34 }
  0x2d   :  { %204 = vmatpush.msra.mxu3 %v156_v35 }
  0x2e   :  { %182 = vmatpush.msra.mxu2 %v139_v36 }
  0x2f   :  { %205 = vmatpush.msra.mxu3 %v155_v37 }
  0x30   :  { %183 = vmatpush.msra.mxu2 %v138_v38 }
  0x31   :  { %206 = vmatpush.msra.mxu3 %v154_v39 }
  0x32   :  { %184 = vmatpush.msra.mxu2 %v137_v40 }
  0x33   :  { %207 = vmatpush.msra.mxu3 %v153_v41 }
  0x94   :  { %v102_v42 = vpop.f32.mrf.mxu0 }
  0x95   :  { %v125_v43 = vpop.f32.mrf.mxu1  ;;  %v131_v44 = vmax.f32 %v102_v42, 0.0 }
  0x96   :  { %v132_v45 = vmax.f32 %v125_v43, 0.0 }
  0x97   :  { %185 = vmatmul.f32.vlgmr.msra.gmra.mxu2 %v131_v44 }
  0x98   :  { %208 = vmatmul.f32.vlgmr.msra.gmra.mxu3 %v132_v45 }
  0x9c   :  { %v105_v46 = vpop.f32.mrf.mxu0 }
  0x9d   :  { %v128_v47 = vpop.f32.mrf.mxu1  ;;  %v133_v48 = vmax.f32 %v105_v46, 0.0 }
  0x9e   :  { %v134_v49 = vmax.f32 %v128_v47, 0.0 }
  0x9f   :  { %188 = vmatmul.f32.gmra.mxu2 %v133_v48 }
  0xa0   :  { %211 = vmatmul.f32.gmra.mxu3 %v134_v49 }
 0x11a   :  { %v186_v50 = vpop.f32.mrf.mxu2 }
 0x11b   :  { %v209_v51 = vpop.f32.mrf.mxu3 }
 0x11c   :  { %v210_v52 = vadd.f32 %v209_v51, %v186_v50 }
 0x11e   :  { %224 = vst [vmem:[#allocation9] sm:$0xff] %v210_v52 }
 0x122   :  { %v189_v53 = vpop.f32.mrf.mxu2 }
 0x123   :  { %v212_v54 = vpop.f32.mrf.mxu3 }
 0x124   :  { %v213_v55 = vadd.f32 %v212_v54, %v189_v53 }
 0x126   :  { %225 = vst [vmem:[#allocation9 + $0x8] sm:$0xff] %v213_v55 }
 0x127   :  { %238 = dma.vmem_to_hbm [thread:$0]  %s231_s29, 256, %s233_s5, [#allocation5], %s364_s24, %s364_s24, %s365_s25  }
 0x128   :  { %358 = dma.done.wait [#allocation5], 256  }
 0x129   :  { %359 = vsyncadd [#allocation5], 4294967040 }
 0x12a   :  { %243 = vsyncpa [#allocation4], 1 }
 0x12b   :  { %244 = vsyncpa [#allocation7], 1 }
 0x12c   :  { %245 = vsyncpa [#allocation5], 1 }

</bundles_post_ra>
